<compile_context>
chip_gen: v7x
topology: tpu7x:2x2x1
jax: 0.10.0
libtpu: 0.0.40
codegen_flags: <defaults>
</compile_context>

<pallas_src>
import math

import jax
import jax.numpy as jnp
from jax.experimental import pallas as pl
from jax.experimental.pallas import tpu as pltpu

# ---------------- config (mirrors cfg in __init__) ----------------
IMG_SIZE = 16          # cfg.img_size
NIN = 3                # cfg.input_channels default 3
LDIM = 32              # cfg.latent_dimension
PIXEL_STD = 0.7        # cfg.pixel_std
PIXEL_BOUND = True     # cfg.pixel_bound
BATCH = 2

D = NIN * IMG_SIZE * IMG_SIZE            # flattened pixel dim = 768
BM = 8                                   # batch tile (sublane multiple)
STATS_W = 4 * LDIM                       # packed stats slab width (=128, lane-dense)

_LOG_2PI = math.log(2.0 * math.pi)
_LOG_PIXEL_STD = math.log(PIXEL_STD)
_HALF_INV_VAR = 0.5 / (PIXEL_STD * PIXEL_STD)          # 0.5 / std^2
_ERR_CONST = D * (_LOG_PIXEL_STD + 0.5 * _LOG_2PI)     # folded constant term of err


def vae_kernel(x_ref, eps_ref, wmu_ref, wls_ref, benc_ref, wdec_ref, bdec_ref,
               recon_ref, stats_ref):
    """Fused VAE forward + loss kernel (one batch tile of BM rows).

    x_ref:    (BM, D)   flattened input image, f32
    eps_ref:  (BM, L)   reparameterization noise ~ N(0,1), f32
    wmu_ref:  (D, L)    encoder weight (mu head), bf16
    wls_ref:  (D, L)    encoder weight (log_sigma head), bf16
    benc_ref: (2, L)    encoder biases [b_mu; b_log_sigma], f32
    wdec_ref: (L, D)    decoder weight, bf16
    bdec_ref: (1, D)    decoder bias, f32
    outputs:  recon (BM, D) f32
              stats (BM, 128) f32 packed [mu|sigma|z|err@96,kl@97,0...]
    """
    x = x_ref[...]                                   # (BM, D) f32
    eps = eps_ref[...]                               # (BM, L) f32
    x_bf = x.astype(jnp.bfloat16)                    # MXU operand only

    # ---- encoder (MXU, bf16 operands, f32 accumulation) ----
    mu = jnp.dot(x_bf, wmu_ref[...],
                 preferred_element_type=jnp.float32) + benc_ref[0:1, :]
    log_sigma = jnp.dot(x_bf, wls_ref[...],
                        preferred_element_type=jnp.float32) + benc_ref[1:2, :]
    sigma = jnp.exp(log_sigma)                       # EUP

    # ---- reparameterization: z = mu + sigma * eps ----
    z = mu + sigma * eps

    # ---- decoder (MXU) ----
    dec = jnp.dot(z.astype(jnp.bfloat16), wdec_ref[...],
                  preferred_element_type=jnp.float32) + bdec_ref[...]
    recon = jax.nn.sigmoid(dec) if PIXEL_BOUND else dec
    recon_ref[...] = recon

    # ---- err = -Normal(recon, pixel_std).log_prob(x).sum(dim=(1,2,3)) ----
    #   = (0.5/std^2) * sum((x - recon)^2) + D*(log std + 0.5*log 2pi)
    #   (scale applied to the reduced scalar, not the full (BM, D) tensor)
    diff = x - recon
    err = _HALF_INV_VAR * jnp.sum(diff * diff, axis=1, keepdims=True) + _ERR_CONST

    # ---- kl = sum(log q(z|mu,sigma) - log p(z; 0,1), dim=1) ----
    #   (z - mu)/sigma == eps exactly, log(sigma) == log_sigma exactly:
    #   kl = sum(0.5*(z^2 - eps^2) - log_sigma)
    kl = jnp.sum(0.5 * (z * z - eps * eps) - log_sigma,
                 axis=1, keepdims=True)                                    # (BM, 1)

    # ---- pack small stats into one lane-dense (BM, 128) slab ----
    # lanes: [mu 0:32 | sigma 32:64 | z 64:96 | err@96 | kl@97 | 0 pad]
    lane = jax.lax.broadcasted_iota(jnp.int32, (mu.shape[0], LDIM), 1)
    extra = jnp.where(lane == 0, err, jnp.where(lane == 1, kl, 0.0))
    stats_ref[...] = jnp.concatenate([mu, sigma, z, extra], axis=1)


def _vae_pallas(x_flat, eps_f, wmu_bf, wls_bf, b_enc, wdec_bf, b_dec2):
    PB = x_flat.shape[0]
    const2d = lambda shape: pl.BlockSpec(shape, lambda i: (0, 0))
    tiled2d = lambda shape: pl.BlockSpec(shape, lambda i: (i, 0))

    out_shape = (
        jax.ShapeDtypeStruct((PB, D), jnp.float32),        # recon
        jax.ShapeDtypeStruct((PB, STATS_W), jnp.float32),  # packed stats slab
    )

    return pl.pallas_call(
        vae_kernel,
        out_shape=out_shape,
        grid_spec=pltpu.PrefetchScalarGridSpec(
            num_scalar_prefetch=0,
            grid=(PB // BM,),
            in_specs=[
                tiled2d((BM, D)),          # x
                tiled2d((BM, LDIM)),       # eps
                const2d((D, LDIM)),        # w_mu (bf16)
                const2d((D, LDIM)),        # w_log_sigma (bf16)
                const2d((2, LDIM)),        # packed encoder biases
                const2d((LDIM, D)),        # w_dec (bf16)
                const2d((1, D)),           # b_dec
            ],
            out_specs=[
                tiled2d((BM, D)),
                tiled2d((BM, STATS_W)),
            ],
        ),
        compiler_params=pltpu.CompilerParams(
            dimension_semantics=("parallel",)),   # batch tiles shard across TCs on v7x
    )(x_flat, eps_f, wmu_bf, wls_bf, b_enc, wdec_bf, b_dec2)


_vae_pallas_jit = jax.jit(_vae_pallas)


def baseline_vae_forward(x_nchw, eps, w_mu, w_ls, b_mu, b_ls, w_dec, b_dec):
    """x_nchw: (B, C, H, W) f32. Returns (recon_nchw, losses, stats, None, None)."""
    B = x_nchw.shape[0]
    PB = ((B + BM - 1) // BM) * BM
    pad = PB - B

    x_flat = x_nchw.reshape(B, D).astype(jnp.float32)
    eps_f = eps.astype(jnp.float32)
    if pad:
        x_flat = jnp.pad(x_flat, ((0, pad), (0, 0)))
        eps_f = jnp.pad(eps_f, ((0, pad), (0, 0)))

    # parameter packing / casting (weights to bf16 for the MXU; biases stay f32)
    wmu_bf = w_mu.astype(jnp.bfloat16)
    wls_bf = w_ls.astype(jnp.bfloat16)
    wdec_bf = w_dec.astype(jnp.bfloat16)
    b_enc = jnp.stack([b_mu, b_ls], axis=0).astype(jnp.float32)   # (2, L)
    b_dec2 = b_dec.reshape(1, D).astype(jnp.float32)

    recon_p, stats_p = _vae_pallas_jit(
        x_flat, eps_f, wmu_bf, wls_bf, b_enc, wdec_bf, b_dec2)

    recon = recon_p[:B].reshape(B, NIN, IMG_SIZE, IMG_SIZE)
    mu = stats_p[:B, 0:LDIM]
    sigma = stats_p[:B, LDIM:2 * LDIM]
    z = stats_p[:B, 2 * LDIM:3 * LDIM]
    err = stats_p[:B, 3 * LDIM]
    kl = stats_p[:B, 3 * LDIM + 1]

    losses = {"err": err, "kl_l": kl}
    stats = {"mu": mu, "sigma": sigma, "z": z}
    return recon, losses, stats, None, None


def _reference_forward(x_nchw, eps, w_mu, w_ls, b_mu, b_ls, w_dec, b_dec):
    """Pure-JAX reference mirroring the PyTorch spec (same bf16 weight rounding)."""
    B = x_nchw.shape[0]
    x = x_nchw.reshape(B, D).astype(jnp.float32)
    x_bf = x.astype(jnp.bfloat16)
    mu = jnp.dot(x_bf, w_mu.astype(jnp.bfloat16),
                 preferred_element_type=jnp.float32) + b_mu
    log_sigma = jnp.dot(x_bf, w_ls.astype(jnp.bfloat16),
                        preferred_element_type=jnp.float32) + b_ls
    sigma = jnp.exp(log_sigma)
    z = mu + sigma * eps
    dec = jnp.dot(z.astype(jnp.bfloat16), w_dec.astype(jnp.bfloat16),
                  preferred_element_type=jnp.float32) + b_dec
    recon = jax.nn.sigmoid(dec) if PIXEL_BOUND else dec

    def normal_logpdf(v, loc, scale):
        return (-0.5 * ((v - loc) / scale) ** 2
                - jnp.log(scale) - 0.5 * _LOG_2PI)

    err = -jnp.sum(normal_logpdf(x, recon, PIXEL_STD), axis=1)
    kl = jnp.sum(normal_logpdf(z, mu, sigma) - normal_logpdf(z, 0.0, 1.0), axis=1)
    return recon.reshape(B, NIN, IMG_SIZE, IMG_SIZE), err, kl, mu, sigma, z


if __name__ == "__main__":
    key = jax.random.PRNGKey(0)
    ks = jax.random.split(key, 8)

    # deterministic example input (images in [0, 1] like genesis preprocessing)
    x = jax.random.uniform(ks[0], (BATCH, NIN, IMG_SIZE, IMG_SIZE), dtype=jnp.float32)
    # reparameterization noise (the single stochastic element of the forward)
    eps = jax.random.normal(ks[1], (BATCH, LDIM), dtype=jnp.float32)

    # deterministic parameters (encoder split into mu / log_sigma heads)
    w_mu = jax.random.normal(ks[2], (D, LDIM), dtype=jnp.float32) * 0.02
    w_ls = jax.random.normal(ks[3], (D, LDIM), dtype=jnp.float32) * 0.02
    b_mu = jax.random.normal(ks[4], (LDIM,), dtype=jnp.float32) * 0.01
    b_ls = jax.random.normal(ks[5], (LDIM,), dtype=jnp.float32) * 0.01
    w_dec = jax.random.normal(ks[6], (LDIM, D), dtype=jnp.float32) * 0.02
    b_dec = jax.random.normal(ks[7], (D,), dtype=jnp.float32) * 0.01

    recon, losses, stats, _, _ = baseline_vae_forward(
        x, eps, w_mu, w_ls, b_mu, b_ls, w_dec, b_dec)
    jax.block_until_ready((recon, losses["err"], losses["kl_l"], stats["z"]))

    # shape / sanity checks
    assert recon.shape == (BATCH, NIN, IMG_SIZE, IMG_SIZE)
    assert losses["err"].shape == (BATCH,)
    assert losses["kl_l"].shape == (BATCH,)
    assert stats["mu"].shape == (BATCH, LDIM)
    assert stats["sigma"].shape == (BATCH, LDIM)
    assert stats["z"].shape == (BATCH, LDIM)
    assert bool(jnp.all(jnp.isfinite(recon)))
    assert bool(jnp.all(jnp.isfinite(losses["err"])))
    assert bool(jnp.all(jnp.isfinite(losses["kl_l"])))

    # numerical check vs. pure-JAX reference of the spec (same bf16 weight rounding)
    r_recon, r_err, r_kl, r_mu, r_sigma, r_z = _reference_forward(
        x, eps, w_mu, w_ls, b_mu, b_ls, w_dec, b_dec)
    assert bool(jnp.allclose(recon, r_recon, rtol=5e-2, atol=5e-3))
    assert bool(jnp.allclose(stats["mu"], r_mu, rtol=5e-2, atol=5e-3))
    assert bool(jnp.allclose(stats["sigma"], r_sigma, rtol=5e-2, atol=5e-3))
    assert bool(jnp.allclose(stats["z"], r_z, rtol=5e-2, atol=5e-3))
    assert bool(jnp.allclose(losses["err"], r_err, rtol=2e-2, atol=1e-1))
    assert bool(jnp.allclose(losses["kl_l"], r_kl, rtol=2e-2, atol=1e-1))

    print("KERNEL_OK")
</pallas_src>

<mosaic_0001>
module attributes {stable_mosaic.version = 11 : i64} {
  func.func @vae_kernel(%arg0: i32, %arg1: memref<8x768xf32, #tpu.memory_space<vmem>>, %arg2: memref<8x32xf32, #tpu.memory_space<vmem>>, %arg3: memref<768x32xbf16, #tpu.memory_space<vmem>>, %arg4: memref<768x32xbf16, #tpu.memory_space<vmem>>, %arg5: memref<2x32xf32, #tpu.memory_space<vmem>>, %arg6: memref<32x768xbf16, #tpu.memory_space<vmem>>, %arg7: memref<1x768xf32, #tpu.memory_space<vmem>>, %arg8: memref<8x768xf32, #tpu.memory_space<vmem>>, %arg9: memref<8x128xf32, #tpu.memory_space<vmem>>) attributes {dimension_semantics = [#tpu.dimension_semantics<parallel>], iteration_bounds = array<i64: 1>, scalar_prefetch = 0 : i64, scratch_operands = 0 : i64, tpu.core_type = #tpu.core_type<tc>, window_params = [{transform_indices = @transform_0, window_bounds = array<i64: 8, 768>}, {transform_indices = @transform_1, window_bounds = array<i64: 8, 32>}, {pipeline_mode = #tpu.pipeline_mode<synchronous>, transform_indices = @transform_2, window_bounds = array<i64: 768, 32>}, {pipeline_mode = #tpu.pipeline_mode<synchronous>, transform_indices = @transform_3, window_bounds = array<i64: 768, 32>}, {pipeline_mode = #tpu.pipeline_mode<synchronous>, transform_indices = @transform_4, window_bounds = array<i64: 2, 32>}, {pipeline_mode = #tpu.pipeline_mode<synchronous>, transform_indices = @transform_5, window_bounds = array<i64: 32, 768>}, {pipeline_mode = #tpu.pipeline_mode<synchronous>, transform_indices = @transform_6, window_bounds = array<i64: 1, 768>}, {transform_indices = @transform_7, window_bounds = array<i64: 8, 768>}, {transform_indices = @transform_8, window_bounds = array<i64: 8, 128>}]} {
    %c0 = arith.constant 0 : index
    %c0_0 = arith.constant 0 : index
    %0 = vector.load %arg1[%c0, %c0_0] : memref<8x768xf32, #tpu.memory_space<vmem>>, vector<8x768xf32>
    %c0_1 = arith.constant 0 : index
    %c0_2 = arith.constant 0 : index
    %1 = vector.load %arg2[%c0_1, %c0_2] : memref<8x32xf32, #tpu.memory_space<vmem>>, vector<8x32xf32>
    %2 = arith.truncf %0 : vector<8x768xf32> to vector<8x768xbf16>
    %c0_3 = arith.constant 0 : index
    %c0_4 = arith.constant 0 : index
    %3 = vector.load %arg3[%c0_3, %c0_4] : memref<768x32xbf16, #tpu.memory_space<vmem>>, vector<768x32xbf16>
    %cst = arith.constant dense<0.000000e+00> : vector<8x32xf32>
    %4 = tpu.matmul %2, %3, %cst {dimension_numbers = #tpu.dot_dimension_numbers<[1], [0], [0], [1], [0, 0, 1, 1], [], []>} : vector<8x768xbf16>, vector<768x32xbf16>, vector<8x32xf32> -> vector<8x32xf32>
    %c0_5 = arith.constant 0 : index
    %c0_6 = arith.constant 0 : index
    %5 = vector.load %arg5[%c0_5, %c0_6] : memref<2x32xf32, #tpu.memory_space<vmem>>, vector<1x32xf32>
    %6 = vector.broadcast %5 : vector<1x32xf32> to vector<8x32xf32>
    %7 = arith.addf %4, %6 : vector<8x32xf32>
    %c0_7 = arith.constant 0 : index
    %c0_8 = arith.constant 0 : index
    %8 = vector.load %arg4[%c0_7, %c0_8] : memref<768x32xbf16, #tpu.memory_space<vmem>>, vector<768x32xbf16>
    %cst_9 = arith.constant dense<0.000000e+00> : vector<8x32xf32>
    %9 = tpu.matmul %2, %8, %cst_9 {dimension_numbers = #tpu.dot_dimension_numbers<[1], [0], [0], [1], [0, 0, 1, 1], [], []>} : vector<8x768xbf16>, vector<768x32xbf16>, vector<8x32xf32> -> vector<8x32xf32>
    %c1 = arith.constant 1 : index
    %c0_10 = arith.constant 0 : index
    %10 = vector.load %arg5[%c1, %c0_10] : memref<2x32xf32, #tpu.memory_space<vmem>>, vector<1x32xf32>
    %11 = vector.broadcast %10 : vector<1x32xf32> to vector<8x32xf32>
    %12 = arith.addf %9, %11 : vector<8x32xf32>
    %13 = math.exp %12 : vector<8x32xf32>
    %14 = arith.mulf %13, %1 : vector<8x32xf32>
    %15 = arith.addf %7, %14 : vector<8x32xf32>
    %16 = arith.truncf %15 : vector<8x32xf32> to vector<8x32xbf16>
    %c0_11 = arith.constant 0 : index
    %c0_12 = arith.constant 0 : index
    %17 = vector.load %arg6[%c0_11, %c0_12] : memref<32x768xbf16, #tpu.memory_space<vmem>>, vector<32x768xbf16>
    %cst_13 = arith.constant dense<0.000000e+00> : vector<8x768xf32>
    %18 = tpu.matmul %16, %17, %cst_13 {dimension_numbers = #tpu.dot_dimension_numbers<[1], [0], [0], [1], [0, 0, 1, 1], [], []>} : vector<8x32xbf16>, vector<32x768xbf16>, vector<8x768xf32> -> vector<8x768xf32>
    %c0_14 = arith.constant 0 : index
    %c0_15 = arith.constant 0 : index
    %19 = vector.load %arg7[%c0_14, %c0_15] : memref<1x768xf32, #tpu.memory_space<vmem>>, vector<1x768xf32>
    %20 = vector.broadcast %19 : vector<1x768xf32> to vector<8x768xf32>
    %21 = arith.addf %18, %20 : vector<8x768xf32>
    %22 = arith.negf %21 : vector<8x768xf32>
    %23 = math.exp %22 : vector<8x768xf32>
    %cst_16 = arith.constant 1.000000e+00 : f32
    %24 = vector.broadcast %cst_16 : f32 to vector<8x768xf32>
    %25 = arith.addf %24, %23 : vector<8x768xf32>
    %26 = arith.divf %24, %25 : vector<8x768xf32>
    %c0_17 = arith.constant 0 : index
    %c0_18 = arith.constant 0 : index
    %27 = vector.load %arg8[%c0_17, %c0_18] : memref<8x768xf32, #tpu.memory_space<vmem>>, vector<8x768xf32>
    tpu.vector_store %arg8[%c0_17, %c0_18], %26 {strides = array<i32>} : memref<8x768xf32, #tpu.memory_space<vmem>>, vector<8x768xf32>,
    %28 = arith.subf %0, %26 : vector<8x768xf32>
    %29 = arith.mulf %28, %28 : vector<8x768xf32>
    %cst_19 = arith.constant dense<0.000000e+00> : vector<8xf32>
    %30 = vector.multi_reduction <add>, %29, %cst_19 [1] : vector<8x768xf32> to vector<8xf32>
    %31 = vector.shape_cast %30 : vector<8xf32> to vector<8x1xf32>
    %cst_20 = arith.constant 1.02040815 : f32
    %32 = vector.broadcast %cst_20 : f32 to vector<8x1xf32>
    %33 = arith.mulf %32, %31 : vector<8x1xf32>
    %cst_21 = arith.constant 431.818451 : f32
    %34 = vector.broadcast %cst_21 : f32 to vector<8x1xf32>
    %35 = arith.addf %33, %34 : vector<8x1xf32>
    %36 = arith.mulf %15, %15 : vector<8x32xf32>
    %37 = arith.mulf %1, %1 : vector<8x32xf32>
    %38 = arith.subf %36, %37 : vector<8x32xf32>
    %cst_22 = arith.constant 5.000000e-01 : f32
    %39 = vector.broadcast %cst_22 : f32 to vector<8x32xf32>
    %40 = arith.mulf %39, %38 : vector<8x32xf32>
    %41 = arith.subf %40, %12 : vector<8x32xf32>
    %cst_23 = arith.constant dense<0.000000e+00> : vector<8xf32>
    %42 = vector.multi_reduction <add>, %41, %cst_23 [1] : vector<8x32xf32> to vector<8xf32>
    %43 = vector.shape_cast %42 : vector<8xf32> to vector<8x1xf32>
    %44 = tpu.iota {dimensions = array<i32: 1>} : vector<8x32xi32>
    %c0_i32 = arith.constant 0 : i32
    %45 = vector.broadcast %c0_i32 : i32 to vector<8x32xi32>
    %46 = arith.cmpi eq, %44, %45 : vector<8x32xi32>
    %c1_i32 = arith.constant 1 : i32
    %47 = vector.broadcast %c1_i32 : i32 to vector<8x32xi32>
    %48 = arith.cmpi eq, %44, %47 : vector<8x32xi32>
    %cst_24 = arith.constant 0.000000e+00 : f32
    %49 = vector.shape_cast %43 : vector<8x1xf32> to vector<8x1xf32>
    %50 = vector.broadcast %49 : vector<8x1xf32> to vector<8x32xf32>
    %51 = vector.broadcast %cst_24 : f32 to vector<8x32xf32>
    %52 = arith.select %48, %50, %51 : vector<8x32xi1>, vector<8x32xf32>
    %53 = vector.shape_cast %35 : vector<8x1xf32> to vector<8x1xf32>
    %54 = vector.broadcast %53 : vector<8x1xf32> to vector<8x32xf32>
    %55 = arith.select %46, %54, %52 : vector<8x32xi1>, vector<8x32xf32>
    %56 = tpu.concatenate %7, %13, %15, %55 in 1 : vector<8x32xf32>, vector<8x32xf32>, vector<8x32xf32>, vector<8x32xf32> -> vector<8x128xf32>
    %c0_25 = arith.constant 0 : index
    %c0_26 = arith.constant 0 : index
    %57 = vector.load %arg9[%c0_25, %c0_26] : memref<8x128xf32, #tpu.memory_space<vmem>>, vector<8x128xf32>
    tpu.vector_store %arg9[%c0_25, %c0_26], %56 {strides = array<i32>} : memref<8x128xf32, #tpu.memory_space<vmem>>, vector<8x128xf32>,
    return
  }
  func.func @transform_0(%arg0: i32) -> (i32, i32) {
    %c0_i32 = arith.constant 0 : i32
    %c0_i32_0 = arith.constant 0 : i32
    return %arg0, %c0_i32 : i32, i32
  }
  func.func @transform_1(%arg0: i32) -> (i32, i32) {
    %c0_i32 = arith.constant 0 : i32
    %c0_i32_0 = arith.constant 0 : i32
    return %arg0, %c0_i32 : i32, i32
  }
  func.func @transform_2(%arg0: i32) -> (i32, i32) {
    %c0_i32 = arith.constant 0 : i32
    %c0_i32_0 = arith.constant 0 : i32
    %c0_i32_1 = arith.constant 0 : i32
    return %c0_i32, %c0_i32_0 : i32, i32
  }
  func.func @transform_3(%arg0: i32) -> (i32, i32) {
    %c0_i32 = arith.constant 0 : i32
    %c0_i32_0 = arith.constant 0 : i32
    %c0_i32_1 = arith.constant 0 : i32
    return %c0_i32, %c0_i32_0 : i32, i32
  }
  func.func @transform_4(%arg0: i32) -> (i32, i32) {
    %c0_i32 = arith.constant 0 : i32
    %c0_i32_0 = arith.constant 0 : i32
    %c0_i32_1 = arith.constant 0 : i32
    return %c0_i32, %c0_i32_0 : i32, i32
  }
  func.func @transform_5(%arg0: i32) -> (i32, i32) {
    %c0_i32 = arith.constant 0 : i32
    %c0_i32_0 = arith.constant 0 : i32
    %c0_i32_1 = arith.constant 0 : i32
    return %c0_i32, %c0_i32_0 : i32, i32
  }
  func.func @transform_6(%arg0: i32) -> (i32, i32) {
    %c0_i32 = arith.constant 0 : i32
    %c0_i32_0 = arith.constant 0 : i32
    %c0_i32_1 = arith.constant 0 : i32
    return %c0_i32, %c0_i32_0 : i32, i32
  }
  func.func @transform_7(%arg0: i32) -> (i32, i32) {
    %c0_i32 = arith.constant 0 : i32
    %c0_i32_0 = arith.constant 0 : i32
    return %arg0, %c0_i32 : i32, i32
  }
  func.func @transform_8(%arg0: i32) -> (i32, i32) {
    %c0_i32 = arith.constant 0 : i32
    %c0_i32_0 = arith.constant 0 : i32
    return %arg0, %c0_i32 : i32, i32
  }
}

</mosaic_0001>

<bundles_post_ra>
// kernel: _vae_pallas.1
= control target key start
LH: loop header
LB: loop body
LE: loop exit
PB: predicated region body
PF: predicated region fallthrough
CT: control target
= control target key end

     0   :  { %14 = vsyncpa [#allocation3], 0  ;;  %s2362_s0 = inlined_call_operand.vmem [shape: f32[8,768], index: 0, kind: input, shape index: {}]   ;;  %s2363_s1 = inlined_call_operand.vmem [shape: f32[8,32], index: 1, kind: input, shape index: {}]   ;;  %s2364_s2 = inlined_call_operand.vmem [shape: bf16[768,32], index: 2, kind: input, shape index: {}]   ;;  %s2365_s3 = inlined_call_operand.vmem [shape: bf16[768,32], index: 3, kind: input, shape index: {}]   ;;  %s2366_s4 = inlined_call_operand.vmem [shape: f32[2,32], index: 4, kind: input, shape index: {}]   ;;  %s2367_s5 = inlined_call_operand.vmem [shape: bf16[32,768], index: 5, kind: input, shape index: {}]   ;;  %s2368_s6 = inlined_call_operand.vmem [shape: f32[1,768], index: 6, kind: input, shape index: {}]   ;;  %s2369_s7 = inlined_call_operand.hbm [shape: f32[8,768], index: 7, kind: output, shape index: {0}]   ;;  %s2370_s8 = inlined_call_operand.hbm [shape: f32[8,128], index: 8, kind: output, shape index: {1}]  }
   0x1   :  { %v1678_v0 = vld [vmem:[%s2364_s2 + $0x40] sm:$0xff]   ;;  %v1682_v4 = vld [vmem:[%s2364_s2 + $0x48] sm:$0xff]   ;;  %v1686_v8 = vld [vmem:[%s2364_s2 + $0x50] sm:$0xff]  }
   0x2   :  { %v1679_v1 = vld [vmem:[%s2364_s2 + $0xc0] sm:$0xff]   ;;  %1540 = vmatprep.subr.bf16.mxu0 %v1678_v0  ;;  %v1683_v5 = vld [vmem:[%s2364_s2 + $0xc8] sm:$0xff]   ;;  %v1687_v9 = vld [vmem:[%s2364_s2 + $0xd0] sm:$0xff]  }
   0x3   :  { %v1680_v2 = vld [vmem:[%s2364_s2] sm:$0xff]   ;;  %1562 = vmatprep.subr.bf16.mxu1 %v1679_v1  ;;  %v1684_v6 = vld [vmem:[%s2364_s2 + $0x8] sm:$0xff]   ;;  %v1688_v10 = vld [vmem:[%s2364_s2 + $0x10] sm:$0xff]  }
   0x4   :  { %v1681_v3 = vld [vmem:[%s2364_s2 + $0x80] sm:$0xff]   ;;  %1541 = vmatpush3.bf16.msra.mxu0 %v1680_v2  ;;  %v1685_v7 = vld [vmem:[%s2364_s2 + $0x88] sm:$0xff]   ;;  %v1689_v11 = vld [vmem:[%s2364_s2 + $0x90] sm:$0xff]  }
   0x5   :  { %1563 = vmatpush3.bf16.msra.mxu1 %v1681_v3  ;;  %1542 = vmatprep.subr.bf16.mxu0 %v1682_v4  ;;  %v1690_v12 = vld [vmem:[%s2364_s2 + $0x58] sm:$0xff]   ;;  %v1694_v16 = vld [vmem:[%s2364_s2 + $0x60] sm:$0xff]   ;;  %v1698_v20 = vld [vmem:[%s2364_s2 + $0x68] sm:$0xff]  }
   0x6   :  { %1564 = vmatprep.subr.bf16.mxu1 %v1683_v5  ;;  %v1691_v13 = vld [vmem:[%s2364_s2 + $0xd8] sm:$0xff]   ;;  %v1695_v17 = vld [vmem:[%s2364_s2 + $0xe0] sm:$0xff]   ;;  %v1699_v21 = vld [vmem:[%s2364_s2 + $0xe8] sm:$0xff]  }
   0x7   :  { %v1692_v14 = vld [vmem:[%s2364_s2 + $0x18] sm:$0xff]   ;;  %v1696_v18 = vld [vmem:[%s2364_s2 + $0x20] sm:$0xff]   ;;  %v1700_v22 = vld [vmem:[%s2364_s2 + $0x28] sm:$0xff]  }
   0x8   :  { %1543 = vmatpush3.bf16.msra.mxu0 %v1684_v6  ;;  %v1693_v15 = vld [vmem:[%s2364_s2 + $0x98] sm:$0xff]   ;;  %v1697_v19 = vld [vmem:[%s2364_s2 + $0xa0] sm:$0xff]   ;;  %v1701_v23 = vld [vmem:[%s2364_s2 + $0xa8] sm:$0xff]  }
   0x9   :  { %1565 = vmatpush3.bf16.msra.mxu1 %v1685_v7  ;;  %1544 = vmatprep.subr.bf16.mxu0 %v1686_v8  ;;  %v1702_v24 = vld [vmem:[%s2364_s2 + $0x70] sm:$0xff]   ;;  %v1706_v28 = vld [vmem:[%s2364_s2 + $0x78] sm:$0xff]   ;;  %v2016_v32 = vld [vmem:[%s2362_s0 + $0x8] sm:$0xff] }
   0xa   :  { %1566 = vmatprep.subr.bf16.mxu1 %v1687_v9  ;;  %v1703_v25 = vld [vmem:[%s2364_s2 + $0xf0] sm:$0xff]   ;;  %v1707_v29 = vld [vmem:[%s2364_s2 + $0xf8] sm:$0xff]   ;;  %v2026_v34 = vld [vmem:[%s2362_s0] sm:$0xff]  ;;  %v39_v35 = vpack.c.bf16 %v2016_v32, %v2016_v32 }
   0xb   :  { %v1704_v26 = vld [vmem:[%s2364_s2 + $0x30] sm:$0xff]   ;;  %v1708_v30 = vld [vmem:[%s2364_s2 + $0x38] sm:$0xff]   ;;  %v2036_v37 = vpack.c.bf16 %v2026_v34, %v2026_v34  ;;  %v1710_v40 = vld [vmem:[%s2364_s2 + $0x140] sm:$0xff]  }
   0xc   :  { %1545 = vmatpush3.bf16.msra.mxu0 %v1688_v10  ;;  %v1705_v27 = vld [vmem:[%s2364_s2 + $0xb0] sm:$0xff]   ;;  %v1709_v31 = vld [vmem:[%s2364_s2 + $0xb8] sm:$0xff]   ;;  %465 = vmatprep.mubr.bf16.mxu0 %v39_v35  ;;  %v1711_v41 = vld [vmem:[%s2365_s3 + $0x40] sm:$0xff]  }
   0xd   :  { %1567 = vmatpush3.bf16.msra.mxu1 %v1689_v11  ;;  %1546 = vmatprep.subr.bf16.mxu0 %v1690_v12  ;;  %v2021_v33 = vld [vmem:[%s2362_s0 + $0x18] sm:$0xff]  ;;  %v2041_v38 = vld [vmem:[%s2362_s0 + $0x10] sm:$0xff]  ;;  %v1712_v42 = vld [vmem:[%s2364_s2 + $0x100] sm:$0xff]  }
   0xe   :  { %1568 = vmatprep.subr.bf16.mxu1 %v1691_v13  ;;  %v2032_v36 = vpack.c.bf16 %v2021_v33, %v2021_v33  ;;  %v2045_v39 = vpack.c.bf16 %v2041_v38, %v2041_v38  ;;  %v1713_v43 = vld [vmem:[%s2365_s3] sm:$0xff]   ;;  %v1714_v44 = vld [vmem:[%s2364_s2 + $0x148] sm:$0xff]   ;;  %v1718_v48 = vld [vmem:[%s2364_s2 + $0x150] sm:$0xff]  }
   0xf   :  { %v1715_v45 = vld [vmem:[%s2365_s3 + $0x48] sm:$0xff]   ;;  %v1719_v49 = vld [vmem:[%s2365_s3 + $0x50] sm:$0xff]   ;;  %v1722_v52 = vld [vmem:[%s2364_s2 + $0x158] sm:$0xff]  }
  0x10   :  { %1547 = vmatpush3.bf16.msra.mxu0 %v1692_v14  ;;  %505 = vmatprep.mubr.bf16.mxu1 %v2032_v36  ;;  %v1716_v46 = vld [vmem:[%s2364_s2 + $0x108] sm:$0xff]   ;;  %v1720_v50 = vld [vmem:[%s2364_s2 + $0x110] sm:$0xff]   ;;  %v1723_v53 = vld [vmem:[%s2365_s3 + $0x58] sm:$0xff]  }
  0x11   :  { %1569 = vmatpush3.bf16.msra.mxu1 %v1693_v15  ;;  %1548 = vmatprep.subr.bf16.mxu0 %v1694_v16  ;;  %v1717_v47 = vld [vmem:[%s2365_s3 + $0x8] sm:$0xff]   ;;  %v1721_v51 = vld [vmem:[%s2365_s3 + $0x10] sm:$0xff]   ;;  %v1724_v54 = vld [vmem:[%s2364_s2 + $0x118] sm:$0xff]  }
  0x12   :  { %1570 = vmatprep.subr.bf16.mxu1 %v1695_v17  ;;  %v1725_v55 = vld [vmem:[%s2365_s3 + $0x18] sm:$0xff]   ;;  %v1726_v56 = vld [vmem:[%s2364_s2 + $0x160] sm:$0xff]   ;;  %v1730_v60 = vld [vmem:[%s2364_s2 + $0x168] sm:$0xff]  }
  0x13   :  { %v1727_v57 = vld [vmem:[%s2365_s3 + $0x60] sm:$0xff]   ;;  %v1731_v61 = vld [vmem:[%s2365_s3 + $0x68] sm:$0xff]   ;;  %v1734_v0 = vld [vmem:[%s2364_s2 + $0x170] sm:$0xff]  }
  0x14   :  { %1549 = vmatpush3.bf16.msra.mxu0 %v1696_v18  ;;  %v1728_v58 = vld [vmem:[%s2364_s2 + $0x120] sm:$0xff]   ;;  %v1732_v62 = vld [vmem:[%s2364_s2 + $0x128] sm:$0xff]   ;;  %v1735_v1 = vld [vmem:[%s2365_s3 + $0x70] sm:$0xff]  }
  0x15   :  { %1571 = vmatpush3.bf16.msra.mxu1 %v1697_v19  ;;  %1550 = vmatprep.subr.bf16.mxu0 %v1698_v20  ;;  %v1729_v59 = vld [vmem:[%s2365_s3 + $0x20] sm:$0xff]   ;;  %v1733_v63 = vld [vmem:[%s2365_s3 + $0x28] sm:$0xff]   ;;  %v1736_v2 = vld [vmem:[%s2364_s2 + $0x130] sm:$0xff]  }
  0x16   :  { %1572 = vmatprep.subr.bf16.mxu1 %v1699_v21  ;;  %v1737_v3 = vld [vmem:[%s2365_s3 + $0x30] sm:$0xff]   ;;  %v1738_v4 = vld [vmem:[%s2364_s2 + $0x178] sm:$0xff]   ;;  %v2149_v8 = vld [vmem:[%s2362_s0 + $0x28] sm:$0xff] }
  0x17   :  { %v1739_v5 = vld [vmem:[%s2365_s3 + $0x78] sm:$0xff]   ;;  %v2154_v9 = vld [vmem:[%s2362_s0 + $0x20] sm:$0xff]  ;;  %v43_v10 = vpack.c.bf16 %v2149_v8, %v2149_v8  ;;  %v1746_v16 = vld [vmem:[%s2365_s3 + $0xc8] sm:$0xff]  }
  0x18   :  { %1551 = vmatpush3.bf16.msra.mxu0 %v1700_v22  ;;  %v1740_v6 = vld [vmem:[%s2364_s2 + $0x138] sm:$0xff]   ;;  %v2160_v11 = vpack.c.bf16 %v2154_v9, %v2154_v9  ;;  %v1742_v12 = vld [vmem:[%s2365_s3 + $0xc0] sm:$0xff]   ;;  %v1747_v17 = vld [vmem:[%s2365_s3 + $0x148] sm:$0xff]  }
  0x19   :  { %1573 = vmatpush3.bf16.msra.mxu1 %v1701_v23  ;;  %1552 = vmatprep.subr.bf16.mxu0 %v1702_v24  ;;  %v1741_v7 = vld [vmem:[%s2365_s3 + $0x38] sm:$0xff]   ;;  %v1743_v13 = vld [vmem:[%s2365_s3 + $0x140] sm:$0xff]   ;;  %v1748_v18 = vld [vmem:[%s2365_s3 + $0x88] sm:$0xff]  }
  0x1a   :  { %1574 = vmatprep.subr.bf16.mxu1 %v1703_v25  ;;  %v1744_v14 = vld [vmem:[%s2365_s3 + $0x80] sm:$0xff]   ;;  %v1749_v19 = vld [vmem:[%s2365_s3 + $0x108] sm:$0xff]   ;;  %v1750_v20 = vld [vmem:[%s2365_s3 + $0xd0] sm:$0xff]  }
  0x1b   :  { %v1745_v15 = vld [vmem:[%s2365_s3 + $0x100] sm:$0xff]   ;;  %v1751_v21 = vld [vmem:[%s2365_s3 + $0x150] sm:$0xff]   ;;  %v1754_v24 = vld [vmem:[%s2365_s3 + $0xd8] sm:$0xff]  }
  0x1c   :  { %1553 = vmatpush3.bf16.msra.mxu0 %v1704_v26  ;;  %v1752_v22 = vld [vmem:[%s2365_s3 + $0x90] sm:$0xff]   ;;  %v1755_v25 = vld [vmem:[%s2365_s3 + $0x158] sm:$0xff]  }
  0x1d   :  { %1575 = vmatpush3.bf16.msra.mxu1 %v1705_v27  ;;  %1554 = vmatprep.subr.bf16.mxu0 %v1706_v28  ;;  %v1753_v23 = vld [vmem:[%s2365_s3 + $0x110] sm:$0xff]   ;;  %v1756_v26 = vld [vmem:[%s2365_s3 + $0x98] sm:$0xff]   ;;  %v1758_v28 = vld [vmem:[%s2365_s3 + $0xe0] sm:$0xff]  }
  0x1e   :  { %1576 = vmatprep.subr.bf16.mxu1 %v1707_v29  ;;  %v1757_v27 = vld [vmem:[%s2365_s3 + $0x118] sm:$0xff]   ;;  %v1759_v29 = vld [vmem:[%s2365_s3 + $0x160] sm:$0xff]  }
  0x20   :  { %1555 = vmatpush3.bf16.msra.mxu0 %v1708_v30  ;;  %v1760_v30 = vld [vmem:[%s2365_s3 + $0xa0] sm:$0xff]  }
  0x21   :  { %1577 = vmatpush3.bf16.msra.mxu1 %v1709_v31  ;;  %1584 = vmatprep.subr.bf16.mxu0 %v1710_v40  ;;  %v1761_v31 = vld [vmem:[%s2365_s3 + $0x120] sm:$0xff]   ;;  %v1765_v40 = vld [vmem:[%s2365_s3 + $0x128] sm:$0xff]  }
  0x22   :  { %1606 = vmatprep.subr.bf16.mxu1 %v1711_v41  ;;  %v1766_v41 = vld [vmem:[%s2365_s3 + $0xf0] sm:$0xff]  }
  0x23   :  { %466 = vmatmul.mubr.bf16.vlgmr.msra.gmra.mrb[0].mxu0 %v2036_v37 }
  0x24   :  { %506 = vmatmul.mubr.bf16.vlgmr.msra.gmra.mrb[0].mxu1 %v2045_v39  ;;  %1585 = vmatpush3.bf16.msra.mxu0 %v1712_v42  ;;  %v1767_v42 = vld [vmem:[%s2365_s3 + $0x170] sm:$0xff]  }
  0x25   :  { %974 = vmatprep.mubr.bf16.mxu1 %v39_v35  ;;  %1607 = vmatpush3.bf16.msra.mxu1 %v1713_v43  ;;  %v1762_v35 = vld [vmem:[%s2365_s3 + $0xe8] sm:$0xff]   ;;  %v1768_v43 = vld [vmem:[%s2365_s3 + $0xb0] sm:$0xff]  }
  0x26   :  { %1586 = vmatprep.subr.bf16.mxu0 %v1714_v44  ;;  %1608 = vmatprep.subr.bf16.mxu1 %v1715_v45  ;;  %v1769_v44 = vld [vmem:[%s2365_s3 + $0x130] sm:$0xff]   ;;  %v1770_v45 = vld [vmem:[%s2365_s3 + $0xf8] sm:$0xff]  }
  0x27   :  { %545 = vmatprep.mubr.bf16.mxu0 %v43_v10 }
  0x28   :  { %1587 = vmatpush3.bf16.msra.mxu0 %v1716_v46  ;;  %v1771_v46 = vld [vmem:[%s2365_s3 + $0x178] sm:$0xff]  }
  0x29   :  { %1609 = vmatpush3.bf16.msra.mxu1 %v1717_v47  ;;  %1588 = vmatprep.subr.bf16.mxu0 %v1718_v48  ;;  %v1772_v47 = vld [vmem:[%s2365_s3 + $0xb8] sm:$0xff]  }
  0x2a   :  { %1610 = vmatprep.subr.bf16.mxu1 %v1719_v49  ;;  %v1773_v48 = vld [vmem:[%s2365_s3 + $0x138] sm:$0xff]  }
  0x2c   :  { %1589 = vmatpush3.bf16.msra.mxu0 %v1720_v50 }
  0x2d   :  { %1611 = vmatpush3.bf16.msra.mxu1 %v1721_v51  ;;  %1590 = vmatprep.subr.bf16.mxu0 %v1722_v52 }
  0x2e   :  { %1612 = vmatprep.subr.bf16.mxu1 %v1723_v53 }
  0x30   :  { %1591 = vmatpush3.bf16.msra.mxu0 %v1724_v54 }
  0x31   :  { %1613 = vmatpush3.bf16.msra.mxu1 %v1725_v55  ;;  %1592 = vmatprep.subr.bf16.mxu0 %v1726_v56 }
  0x32   :  { %1614 = vmatprep.subr.bf16.mxu1 %v1727_v57 }
  0x34   :  { %1593 = vmatpush3.bf16.msra.mxu0 %v1728_v58 }
  0x35   :  { %1615 = vmatpush3.bf16.msra.mxu1 %v1729_v59  ;;  %1594 = vmatprep.subr.bf16.mxu0 %v1730_v60 }
  0x36   :  { %1616 = vmatprep.subr.bf16.mxu1 %v1731_v61 }
  0x38   :  { %1595 = vmatpush3.bf16.msra.mxu0 %v1732_v62 }
  0x39   :  { %1617 = vmatpush3.bf16.msra.mxu1 %v1733_v63  ;;  %1596 = vmatprep.subr.bf16.mxu0 %v1734_v0 }
  0x3a   :  { %1618 = vmatprep.subr.bf16.mxu1 %v1735_v1 }
  0x3c   :  { %1597 = vmatpush3.bf16.msra.mxu0 %v1736_v2 }
  0x3d   :  { %1619 = vmatpush3.bf16.msra.mxu1 %v1737_v3  ;;  %1598 = vmatprep.subr.bf16.mxu0 %v1738_v4 }
  0x3e   :  { %1620 = vmatprep.subr.bf16.mxu1 %v1739_v5 }
  0x40   :  { %1599 = vmatpush3.bf16.msra.mxu0 %v1740_v6 }
  0x41   :  { %1621 = vmatpush3.bf16.msra.mxu1 %v1741_v7  ;;  %1628 = vmatprep.subr.bf16.mxu0 %v1742_v12 }
  0x42   :  { %1650 = vmatprep.subr.bf16.mxu1 %v1743_v13 }
  0x43   :  { %546 = vmatmul.mubr.bf16.vlgmr.msra.gmra.mrb[4].mxu0 %v2160_v11 }
  0x44   :  { %975 = vmatmul.mubr.bf16.vlgmr.msra.gmra.mrb[4].mxu1 %v2036_v37  ;;  %1629 = vmatpush3.bf16.msra.mxu0 %v1744_v14  ;;  %v1764_v37 = vld [vmem:[%s2365_s3 + $0xa8] sm:$0xff]  }
  0x45   :  { %1651 = vmatpush3.bf16.msra.mxu1 %v1745_v15  ;;  %1014 = vmatprep.mubr.bf16.mxu0 %v2032_v36  ;;  %v1763_v36 = vld [vmem:[%s2365_s3 + $0x168] sm:$0xff]  }
  0x46   :  { %1630 = vmatprep.subr.bf16.mxu0 %v1746_v16  ;;  %1054 = vmatprep.mubr.bf16.mxu1 %v43_v10 }
  0x47   :  { %1652 = vmatprep.subr.bf16.mxu1 %v1747_v17 }
  0x48   :  { %1631 = vmatpush3.bf16.msra.mxu0 %v1748_v18 }
  0x49   :  { %1653 = vmatpush3.bf16.msra.mxu1 %v1749_v19  ;;  %1632 = vmatprep.subr.bf16.mxu0 %v1750_v20 }
  0x4a   :  { %1654 = vmatprep.subr.bf16.mxu1 %v1751_v21 }
  0x4c   :  { %1633 = vmatpush3.bf16.msra.mxu0 %v1752_v22 }
  0x4d   :  { %1655 = vmatpush3.bf16.msra.mxu1 %v1753_v23  ;;  %1634 = vmatprep.subr.bf16.mxu0 %v1754_v24 }
  0x4e   :  { %1656 = vmatprep.subr.bf16.mxu1 %v1755_v25 }
  0x50   :  { %1635 = vmatpush3.bf16.msra.mxu0 %v1756_v26 }
  0x51   :  { %1657 = vmatpush3.bf16.msra.mxu1 %v1757_v27  ;;  %1636 = vmatprep.subr.bf16.mxu0 %v1758_v28 }
  0x52   :  { %1658 = vmatprep.subr.bf16.mxu1 %v1759_v29 }
  0x54   :  { %1637 = vmatpush3.bf16.msra.mxu0 %v1760_v30 }
  0x55   :  { %1659 = vmatpush3.bf16.msra.mxu1 %v1761_v31  ;;  %1638 = vmatprep.subr.bf16.mxu0 %v1762_v35 }
  0x56   :  { %1660 = vmatprep.subr.bf16.mxu1 %v1763_v36 }
  0x58   :  { %1639 = vmatpush3.bf16.msra.mxu0 %v1764_v37 }
  0x59   :  { %1661 = vmatpush3.bf16.msra.mxu1 %v1765_v40  ;;  %1640 = vmatprep.subr.bf16.mxu0 %v1766_v41 }
  0x5a   :  { %1662 = vmatprep.subr.bf16.mxu1 %v1767_v42 }
  0x5c   :  { %1641 = vmatpush3.bf16.msra.mxu0 %v1768_v43 }
  0x5d   :  { %1663 = vmatpush3.bf16.msra.mxu1 %v1769_v44  ;;  %1642 = vmatprep.subr.bf16.mxu0 %v1770_v45 }
  0x5e   :  { %1664 = vmatprep.subr.bf16.mxu1 %v1771_v46 }
  0x60   :  { %1643 = vmatpush3.bf16.msra.mxu0 %v1772_v47 }
  0x61   :  { %1665 = vmatpush3.bf16.msra.mxu1 %v1773_v48 }
  0x63   :  { %1015 = vmatmul.mubr.bf16.vlgmr.msra.gmra.mrb[8].mxu0 %v2045_v39 }
  0x64   :  { %1055 = vmatmul.mubr.bf16.vlgmr.msra.gmra.mrb[8].mxu1 %v2160_v11 }
  0x65   :  { %15 = vsyncpa [#allocation5], 0  ;;  %v1774_v49 = vld [vmem:[%s2367_s5] ss:$24 sps:$4 sm:$0xff]   ;;  %v1776_v50 = vld [vmem:[%s2367_s5 + $0x4] ss:$24 sps:$4 sm:$0xff]  }
  0x66   :  { %v1777_v51 = vld [vmem:[%s2367_s5 + $0x8] ss:$24 sps:$4 sm:$0xff]   ;;  %v1779_v52 = vld [vmem:[%s2367_s5 + $0xc] ss:$24 sps:$4 sm:$0xff]   ;;  %1175 = vmatprep.subr.bf16.mxu0 %v1776_v50  ;;  %v1783_v54 = vld [vmem:[%s2367_s5 + $0x38] ss:$24 sps:$4 sm:$0xff]  }
  0x67   :  { %1176 = vmatpush1.bf16.msra.mxu0 %v1774_v49  ;;  %1216 = vmatprep.subr.bf16.mxu1 %v1779_v52  ;;  %v1780_v39 = vld [vmem:[%s2367_s5 + $0x30] ss:$24 sps:$4 sm:$0xff]   ;;  %v1782_v53 = vld [vmem:[%s2367_s5 + $0x34] ss:$24 sps:$4 sm:$0xff]   ;;  %v1866_v57 = vmov 0   ;;  %v37_v40 = vld [vmem:[%s2363_s1] sm:$0xff] }
  0x68   :  { %1217 = vmatpush1.bf16.msra.mxu1 %v1777_v51  ;;  %v1785_v55 = vld [vmem:[%s2367_s5 + $0x3c] ss:$24 sps:$4 sm:$0xff]   ;;  %1177 = vmatprep.subr.bf16.mxu0 %v1782_v53  ;;  %v1421_v60 = vld [vmem:[%s2366_s4] ss:$0 sm:$0xff]  ;;  %v1470_v20 = vld [vmem:[%s2366_s4 + $0x1] ss:$0 sm:$0xff]  ;;  %v1362_v44 = vmul.f32 %v37_v40, %v37_v40 }
  0x69   :  { %1218 = vmatprep.subr.bf16.mxu1 %v1785_v55  ;;  %v1788_v56 = vld [vmem:[%s2367_s5 + $0x14] ss:$24 sps:$4 sm:$0xff]   ;;  %1207 = vmatprep.mubr.bf16.mxu0 %v1866_v57  ;;  %s1867_s4 = smov 32   ;;  %v1786_v45 = vld [vmem:[%s2367_s5 + $0x10] ss:$24 sps:$4 sm:$0xff]   ;;  %vm1171_vm0 = vcmask 261120  }
  0x6a   :  { %1248 = vmatprep.mubr.bf16.mxu1 %v1866_v57  ;;  %s1868_s28 = smov 64   ;;  %v1791_v47 = vld [vmem:[%s2367_s5 + $0x44] ss:$24 sps:$4 sm:$0xff]   ;;  %v1789_v50 = vld [vmem:[%s2367_s5 + $0x40] ss:$24 sps:$4 sm:$0xff]   ;;  %s1869_s5 = smov [#allocation2]  }
  0x6b   :  { %1178 = vmatpush1.bf16.msra.mxu0 %v1780_v39  ;;  %v1081_v39 = vlaneseq }
  0x6c   :  { %1219 = vmatpush1.bf16.msra.mxu1 %v1783_v54  ;;  %1257 = vmatprep.subr.bf16.mxu0 %v1788_v56  ;;  %v1079_v56 = vld [vmem:[%s2368_s6] sm:$0x3f]  ;;  %s1399_s6 = sshll.u32 %s1869_s5, 4  ;;  %s1400_s6 = int_to_ptr.vmem [resolvable:$true] %s1399_s6 }
  0x6d   :  { %v1082_v53 = vshrl.u32 %v1081_v39, 7  ;;  %s1818_s11 = scalar_lea.vmem %s1400_s6, 768  ;;  %p1823_p1 = scmp.lt.s32.totalorder %s1400_s6, %s1400_s6 }
  0x6e   :  { %p1819_p0 = scmp.ne.s32.totalorder %s1400_s6, %s1818_s11  ;;  %p1824_p2 = scmp.lt.s32.totalorder %s1818_s11, %s1818_s11 }
  0x6f   :  { %v1083_v54 = vsub.s32 0, %v1082_v53  ;;  %v1091_v55 = vsub.s32 2, %v1082_v53 }
  0x70   :  { %p1825_p3 = por %p1824_p2, %p1823_p1 }
  0x72   :  { %p1826_p4 = pnand %p1825_p3, %p1819_p0 }
  0xf6   :  { %v1556_v58 = vpop.f32.mrb[0].mxu0 }
  0xf7   :  { %v1578_v59 = vpop.f32.mrb[0].mxu1  ;;  %v1557_v61 = vpop.f32.mrb[1].mxu0 }
  0xf8   :  { %v1579_v62 = vpop.f32.mrb[1].mxu1  ;;  %v1558_v63 = vadd.f32 %v1557_v61, %v1556_v58  ;;  %v1559_v1 = vpop.f32.mrb[2].mxu0  ;;  %v1087_v58 = vsub.s32 1, %v1082_v53 }
  0xf9   :  { %v1580_v0 = vadd.f32 %v1579_v62, %v1578_v59  ;;  %v1581_v2 = vpop.f32.mrb[2].mxu1  ;;  %v1560_v3 = vpop.f32.mrb[3].mxu0  ;;  %v1084_v59 = vrot.slane %v1079_v56, %v1083_v54 }
  0xfa   :  { %v1582_v4 = vpop.f32.mrb[3].mxu1  ;;  %v468_v5 = vadd.f32 %v1558_v63, %v1421_v60  ;;  %v1092_v60 = vrot.slane %v1079_v56, %v1091_v55  ;;  %v1088_v61 = vrot.slane %v1079_v56, %v1087_v58 }
  0xfc   :  { %v508_v6 = vadd.f32 %v1580_v0, %v468_v5  ;;  %v1099_v5 = vsub.s32 4, %v1082_v53 }
 0x116   :  { %v1600_v7 = vpop.f32.mrb[4].mxu0 }
 0x117   :  { %v1622_v10 = vpop.f32.mrb[4].mxu1  ;;  %v1601_v11 = vpop.f32.mrb[5].mxu0 }
 0x118   :  { %v1602_v12 = vadd.f32 %v1601_v11, %v1600_v7  ;;  %v1623_v13 = vpop.f32.mrb[5].mxu1  ;;  %v1603_v14 = vpop.f32.mrb[6].mxu0 }
 0x119   :  { %v1624_v15 = vadd.f32 %v1623_v13, %v1622_v10  ;;  %v1625_v16 = vpop.f32.mrb[6].mxu1  ;;  %v1604_v17 = vpop.f32.mrb[7].mxu0 }
 0x11a   :  { %v2293_v18 = vadd.f32 %v1602_v12, %v508_v6  ;;  %v1626_v19 = vpop.f32.mrb[7].mxu1  ;;  %v1103_v12 = vsub.s32 5, %v1082_v53 }
 0x11b   :  { %v977_v24 = vadd.f32 %v1624_v15, %v1470_v20  ;;  %v1100_v20 = vrot.slane %v1079_v56, %v1099_v5 }
 0x136   :  { %v1644_v21 = vpop.f32.mrb[8].mxu0 }
 0x137   :  { %v1666_v22 = vpop.f32.mrb[8].mxu1  ;;  %v1645_v23 = vpop.f32.mrb[9].mxu0 }
 0x138   :  { %v1646_v25 = vadd.f32 %v1645_v23, %v1644_v21  ;;  %v1667_v26 = vpop.f32.mrb[9].mxu1  ;;  %v1647_v27 = vpop.f32.mrb[10].mxu0  ;;  %v1104_v21 = vrot.slane %v1079_v56, %v1103_v12 }
 0x139   :  { %v1668_v28 = vadd.f32 %v1667_v26, %v1666_v22  ;;  %v1669_v29 = vpop.f32.mrb[10].mxu1  ;;  %v1648_v30 = vpop.f32.mrb[11].mxu0 }
 0x13a   :  { %v1017_v31 = vadd.f32 %v1646_v25, %v977_v24  ;;  %v1670_v35 = vpop.f32.mrb[11].mxu1 }
 0x13c   :  { %v2298_v36 = vadd.f32 %v1668_v28, %v1017_v31 }
 0x13e   :  { %v1062_v37 = vmul.f32 1.442695, %v2298_v36 }
 0x140   :  { %1792 = vpow2.f32 %v1062_v37 }
 0x14a   :  { %v1793_v41 = vpop.eup %1792 }
 0x14b   :  { %1376 = vrot.lane.b32.xlu1 %v1793_v41, %s1867_s4  ;;  %v1064_v42 = vmul.f32 %v1793_v41, %v37_v40 }
 0x14d   :  { %v1065_v43 = vadd.f32 %v1064_v42, %v2293_v18 }
 0x14f   :  { %1380 = vrot.lane.b32.xlu1 %v1065_v43, %s1868_s28  ;;  %v1066_v46 = vpack.c.bf16 %v1065_v43, %v1065_v43  ;;  %v1361_v48 = vmul.f32 %v1065_v43, %v1065_v43 }
 0x151   :  { %1531 = vmatmul.mubr.msk.bf16.vlgmr.msra.gmra.mrb[12].mxu0 %vm1171_vm0, %v1066_v46  ;;  %1532 = vmatmul.mubr.msk.bf16.vlgmr.msra.gmra.mrb[12].mxu1 %vm1171_vm0, %v1066_v46  ;;  %v1363_v49 = vsub.f32 %v1361_v48, %v1362_v44 }
 0x152   :  { %1258 = vmatpush1.bf16.msra.mxu0 %v1786_v45  ;;  %1289 = vmatprep.mubr.bf16.mxu0 %v1866_v57  ;;  %v1095_v57 = vsub.s32 3, %v1082_v53 }
 0x153   :  { %1259 = vmatprep.subr.bf16.mxu0 %v1791_v47  ;;  %v2316_v51 = vmul.f32 0.5, %v1363_v49 }
 0x154   :  { %v1096_v62 = vrot.slane %v1079_v56, %v1095_v57 }
 0x155   :  { %v1365_v52 = vsub.f32 %v2316_v51, %v2298_v36 }
 0x156   :  { %1260 = vmatpush1.bf16.msra.mxu0 %v1789_v50 }
 0x159   :  { %1533 = vmatmul.mubr.msk.bf16.vlgmr.msra.gmra.mrb[16].mxu0 %vm1171_vm0, %v1066_v46 }
 0x224   :  { %v1209_v63 = vpop.f32.mrb[12].mxu0  ;;  %v1250_v0 = vpop.f32.mrb[12].mxu1 }
 0x225   :  { %v1210_v1 = vadd.f32 %v1209_v63, %v1084_v59  ;;  %v1251_v2 = vadd.f32 %v1250_v0, %v1092_v60  ;;  %v1211_v3 = vpop.f32.mrb[13].mxu0  ;;  %v1252_v4 = vpop.f32.mrb[13].mxu1 }
 0x226   :  { %v1212_v6 = vadd.f32 %v1211_v3, %v1088_v61  ;;  %v1253_v7 = vadd.f32 %v1252_v4, %v1096_v62  ;;  %v1213_v10 = vpop.f32.mrb[14].mxu0  ;;  %v1254_v11 = vpop.f32.mrb[14].mxu1 }
 0x227   :  { %v1534_v13 = vmul.f32 -1.442695, %v1210_v1  ;;  %v1536_v14 = vmul.f32 -1.442695, %v1251_v2  ;;  %v1214_v15 = vpop.f32.mrb[15].mxu0  ;;  %v1255_v16 = vpop.f32.mrb[15].mxu1 }
 0x228   :  { %v1535_v17 = vmul.f32 -1.442695, %v1212_v6  ;;  %v1537_v19 = vmul.f32 -1.442695, %v1253_v7 }
 0x229   :  { %1794 = vpow2.f32 %v1534_v13 }
 0x22a   :  { %1796 = vpow2.f32 %v1536_v14 }
 0x22b   :  { %1798 = vpow2.f32 %v1535_v17 }
 0x22c   :  { %1800 = vpow2.f32 %v1537_v19  ;;  %v1291_v22 = vpop.f32.mrb[16].mxu0 }
 0x22d   :  { %v1292_v23 = vadd.f32 %v1291_v22, %v1100_v20  ;;  %v1293_v24 = vpop.f32.mrb[17].mxu0 }
 0x22e   :  { %v1294_v25 = vadd.f32 %v1293_v24, %v1104_v21  ;;  %v1295_v26 = vpop.f32.mrb[18].mxu0 }
 0x22f   :  { %v1538_v27 = vmul.f32 -1.442695, %v1292_v23  ;;  %v1296_v28 = vpop.f32.mrb[19].mxu0 }
 0x230   :  { %v1539_v29 = vmul.f32 -1.442695, %v1294_v25 }
 0x231   :  { %1802 = vpow2.f32 %v1538_v27 }
 0x232   :  { %1804 = vpow2.f32 %v1539_v29 }
 0x233   :  { %v1795_v30 = vpop.eup %1794 }
 0x234   :  { %v1797_v31 = vpop.eup %1796  ;;  %v1316_v35 = vadd.f32 1.0, %v1795_v30 }
 0x235   :  { %v1799_v37 = vpop.eup %1798  ;;  %v1318_v40 = vadd.f32 1.0, %v1797_v31 }
 0x236   :  { %v1801_v41 = vpop.eup %1800  ;;  %1806 = vrcp.f32 %v1316_v35  ;;  %v1317_v42 = vadd.f32 1.0, %v1799_v37 }
 0x237   :  { %1808 = vrcp.f32 %v1318_v40  ;;  %v1319_v43 = vadd.f32 1.0, %v1801_v41 }
 0x238   :  { %1810 = vrcp.f32 %v1317_v42 }
 0x239   :  { %1812 = vrcp.f32 %v1319_v43 }
 0x23b   :  { %v1803_v44 = vpop.eup %1802 }
 0x23c   :  { %v1805_v45 = vpop.eup %1804  ;;  %v1320_v46 = vadd.f32 1.0, %v1803_v44 }
 0x23d   :  { %v1321_v47 = vadd.f32 1.0, %v1805_v45 }
 0x23e   :  { %1814 = vrcp.f32 %v1320_v46 }
 0x23f   :  { %1816 = vrcp.f32 %v1321_v47 }
 0x240   :  { %v1807_v48 = vpop.eup %1806 }
 0x241   :  { %v1809_v49 = vpop.eup %1808  ;;  %1334 = vst [vmem:[#allocation2] sm:$0xff] %v1807_v48  ;;  %v1340_v50 = vsub.f32 %v2026_v34, %v1807_v48 }
 0x242   :  { %v1811_v53 = vpop.eup %1810  ;;  %1336 = vst [vmem:[#allocation2 + $0x10] sm:$0xff] %v1809_v49  ;;  %v1342_v56 = vsub.f32 %v2041_v38, %v1809_v49 }
 0x243   :  { %v1813_v54 = vpop.eup %1812  ;;  %1335 = vst [vmem:[#allocation2 + $0x8] sm:$0xff] %v1811_v53  ;;  %v1341_v55 = vsub.f32 %v2016_v32, %v1811_v53  ;;  %v1346_v58 = vmul.f32 %v1340_v50, %v1340_v50 }
 0x244   :  { %1337 = vst [vmem:[#allocation2 + $0x18] sm:$0xff] %v1813_v54  ;;  %v1343_v57 = vsub.f32 %v2021_v33, %v1813_v54  ;;  %v1348_v60 = vmul.f32 %v1342_v56, %v1342_v56  ;;  %v1366_v33 = vsel %vm1171_vm0, %v1365_v52, 0.0 }
 0x245   :  { %v1347_v59 = vmul.f32 %v1341_v55, %v1341_v55 }
 0x246   :  { %v1349_v0 = vmul.f32 %v1343_v57, %v1343_v57 }
 0x247   :  { %v1352_v61 = vadd.f32 %v1347_v59, %v1346_v58 }
 0x248   :  { %v1815_v62 = vpop.eup %1814 }
 0x249   :  { %v1817_v63 = vpop.eup %1816  ;;  %1338 = vst [vmem:[#allocation2 + $0x20] sm:$0xff] %v1815_v62  ;;  %v1344_v34 = vsub.f32 %v2154_v9, %v1815_v62  ;;  %v1353_v1 = vadd.f32 %v1352_v61, %v1348_v60  ;;  %v1370_v9 = vand.u32 127, %v1081_v39 }
 0x24a   :  { %1339 = vst [vmem:[#allocation2 + $0x28] sm:$0xff] %v1817_v63  ;;  %v1345_v2 = vsub.f32 %v2149_v8, %v1817_v63 }
 0x24b   :  { %v1350_v32 = vmul.f32 %v1344_v34, %v1344_v34  ;;  %v1354_v3 = vadd.f32 %v1353_v1, %v1349_v0 }
 0x24c   :  { %v1351_v38 = vmul.f32 %v1345_v2, %v1345_v2 }
 0x24d   :  { %v1355_v4 = vadd.f32 %v1354_v3, %v1350_v32 }
 0x24f   :  { %v1356_v5 = vadd.f32 %v1355_v4, %v1351_v38 }
 0x251   :  { %1357 = vadd.xlane.f32.xlu0 %v1356_v5 }
 0x255   :  { %1367 = vadd.xlane.f32.xlu0 %v1366_v33 }
 0x256   :  { %1829 = shalt.err (!%p1826_p4)
}
 0x257   :  { %s1830_s13 = scalar_lea.hbm %s2369_s7, 768 }
 0x258   :  { %p1831_p5 = scmp.ne.s32.totalorder %s2369_s7, %s1830_s13  ;;  %p1834_p6 = scmp.lt.u32.totalorder %s1830_s13, %s2369_s7 }
 0x25a   :  { %p1836_p7 = pnand %p1834_p6, %p1831_p5 }
 0x25c   :  { %1839 = shalt.err (!%p1836_p7)
}
 0x25d   :  { %1402 = dma.vmem_to_hbm [thread:$0]  %s1400_s6, 768, %s2369_s7, [#allocation3]   ;;  %vm1372_vm1 = vcmp.eq.s32.totalorder %v1370_v9, 1  ;;  %vm1371_vm2 = vcmp.eq.s32.totalorder %v1370_v9, 0  ;;  %v1377_v7 = vpop.permute.xlu1 %1376  ;;  %vm1388_vm3 = vcmask 523264   ;;  %vm1390_vm4 = vcmask 785408  }
 0x25e   :  { %s1870_s19 = smov 96   ;;  %s1871_s20 = smov [#allocation4]   ;;  %v1387_v11 = vsel %vm1171_vm0, %v2293_v18, %v1377_v7 }
 0x25f   :  { %s1409_s21 = sshll.u32 %s1871_s20, 4  ;;  %s1410_s21 = int_to_ptr.vmem [resolvable:$true] %s1409_s21 }
 0x260   :  { %s1840_s7 = scalar_lea.vmem %s1410_s21, 128  ;;  %p1845_p9 = scmp.lt.s32.totalorder %s1410_s21, %s1410_s21 }
 0x261   :  { %v1381_v10 = vpop.permute.xlu1 %1380  ;;  %p1841_p8 = scmp.ne.s32.totalorder %s1410_s21, %s1840_s7  ;;  %p1846_p10 = scmp.lt.s32.totalorder %s1840_s7, %s1840_s7 }
 0x262   :  { %v1389_v12 = vsel %vm1388_vm3, %v1387_v11, %v1381_v10 }
 0x263   :  { %p1847_p11 = por %p1846_p10, %p1845_p9 }
 0x265   :  { %p1848_p12 = pnand %p1847_p11, %p1841_p8 }
 0x2de   :  { %v1358_v8 = vpop.xlane.xlu0 %1357 }
 0x2df   :  { %v1359_v36 = vmul.f32 1.0204082, %v1358_v8 }
 0x2e1   :  { %v1360_v51 = vadd.f32 431.81845, %v1359_v36 }
 0x2e2   :  { %v1368_v52 = vpop.xlane.xlu0 %1367 }
 0x2e3   :  { %v1373_v39 = vsel %vm1372_vm1, %v1368_v52, 0.0 }
 0x2e4   :  { %v1374_v6 = vsel %vm1371_vm2, %v1360_v51, %v1373_v39 }
 0x2e5   :  { %1384 = vrot.lane.b32.xlu0 %v1374_v6, %s1870_s19 }
 0x357   :  { %v1385_v13 = vpop.permute.xlu0 %1384 }
 0x358   :  { %v1391_v14 = vsel %vm1390_vm4, %v1389_v12, %v1385_v13 }
 0x359   :  { %1392 = vst [vmem:[#allocation4] sm:$0xff] %v1391_v14 }
 0x35a   :  { %1851 = shalt.err (!%p1848_p12)
}
 0x35b   :  { %s1852_s24 = scalar_lea.hbm %s2370_s8, 128 }
 0x35c   :  { %p1853_p13 = scmp.ne.s32.totalorder %s2370_s8, %s1852_s24  ;;  %p1856_p0 = scmp.lt.u32.totalorder %s1852_s24, %s2370_s8 }
 0x35e   :  { %p1858_p1 = pnand %p1856_p0, %p1853_p13 }
 0x360   :  { %1861 = shalt.err (!%p1858_p1)
}
 0x361   :  { %1412 = dma.vmem_to_hbm [thread:$0]  %s1410_s21, 128, %s2370_s8, [#allocation5]  }
 0x362   :  { %1862 = dma.done.wait [#allocation3], 768  }
 0x363   :  { %1863 = vsyncadd [#allocation3], 4294966528 }
 0x364   :  { %1864 = dma.done.wait [#allocation5], 128  }
 0x365   :  { %1865 = vsyncadd [#allocation5], 4294967168 }
 0x366   :  { %1419 = vsyncpa [#allocation3], 1 }
 0x367   :  { %1420 = vsyncpa [#allocation5], 1 }

</bundles_post_ra>
